<compile_context>
chip_gen: v7x
topology: tpu7x:2x2x1
jax: 0.10.0
libtpu: 0.0.40
codegen_flags: <defaults>
</compile_context>

<pallas_src>
import jax
import jax.numpy as jnp
from jax.experimental import pallas as pl
from jax.experimental.pallas import tpu as pltpu


def _ffn_kernel(x_ref, prev_ref, keep_ref, mu_k_ref, mu_r_ref,
                wk_ref, wv_ref, wr_ref, o_ref,
                acc_ref, xk_ref, sig_ref):
    j = pl.program_id(1)
    nj = pl.num_programs(1)

    # Per-row-tile work (token shift, both lerp mixes, receptance matmul,
    # sigmoid) hoisted to the first I-chunk; inner chunks are MXU-only.
    @pl.when(j == 0)
    def _():
        acc_ref[...] = jnp.zeros_like(acc_ref)

        x = x_ref[...].astype(jnp.float32)

        # In-kernel token shift: shifted[p] = x[p-1] (XLU sublane roll),
        # row 0 patched with the previous row tile's last row, and sequence
        # starts zeroed via the precomputed keep mask.
        shifted = pltpu.roll(x, shift=1, axis=0)
        row_ids = jax.lax.broadcasted_iota(jnp.int32, x.shape, 0)
        shifted = jnp.where(row_ids == 0,
                            prev_ref[...].astype(jnp.float32), shifted)
        shifted = shifted * keep_ref[...]          # (row_tile, 1) f32 mask
        d = shifted - x

        # Hoisted key-mix (bf16 scratch, reused by every I-chunk).
        xk_ref[...] = (x + d * mu_k_ref[...].astype(jnp.float32)
                       ).astype(xk_ref.dtype)

        # Receptance branch done once per row tile.
        xr = (x + d * mu_r_ref[...].astype(jnp.float32)).astype(wr_ref.dtype)
        r = jnp.dot(xr, wr_ref[...], preferred_element_type=jnp.float32)
        sig_ref[...] = jax.nn.sigmoid(r)

    # Per I-chunk: key matmul + sqrelu + value accumulation (MXU work only).
    k = jnp.dot(xk_ref[...], wk_ref[...], preferred_element_type=jnp.float32)
    k = jnp.square(jnp.maximum(k, 0.0))                       # sqrelu
    acc_ref[...] += jnp.dot(k.astype(wv_ref.dtype), wv_ref[...],
                            preferred_element_type=jnp.float32)

    # Finalize is cheap: gate and store.
    @pl.when(j == nj - 1)
    def _():
        o_ref[...] = (sig_ref[...] * acc_ref[...]).astype(o_ref.dtype)


def rwkv6_feedforward(x, mu_k, mu_r, wk_t, wv_t, wr_t, *,
                      row_tile=512, i_tile=512,
                      compute_dtype=jnp.bfloat16,
                      vmem_limit_bytes=48 * 1024 * 1024):
    """RWKV6 FFN forward (prefill path).

    x: [B, T, H]; wk_t: [H, I], wv_t: [I, H], wr_t: [H, H] (nn.Linear weights
    pre-transposed to [in, out]). row_tile guidance: ~256 (v5e), ~512 (v7x),
    768-1024 (v6e, 128 MiB VMEM headroom).
    """
    B, T, H = x.shape
    I = wk_t.shape[1]
    rows = B * T

    # Activations streamed in bf16 (halves activation HBM/VMEM bytes); the
    # lerp mixes are still done in f32 inside the kernel.
    x2d = x.reshape(rows, H).astype(compute_dtype)
    mu_k2d = mu_k.reshape(1, H).astype(jnp.float32)
    mu_r2d = mu_r.reshape(1, H).astype(jnp.float32)

    # Row tiling (multiple of 8 sublanes unless it covers all rows).
    if row_tile >= rows:
        row_tile = rows
    else:
        row_tile = max(8, (row_tile // 8) * 8)
    num_row_tiles = -(-rows // row_tile)

    # Token-shift side inputs (no materialized [B,T,H] shifted stream):
    #  * prev_rows[i] = last row of the previous row tile (patches block row 0)
    #  * keep[n]      = 0.0 at sequence starts (n % T == 0), else 1.0
    prev_idx = jnp.maximum(jnp.arange(num_row_tiles) * row_tile - 1, 0)
    prev_rows = x2d[prev_idx].reshape(num_row_tiles, 1, H)
    keep = (jnp.arange(rows, dtype=jnp.int32) % T != 0).astype(jnp.float32)
    keep = keep.reshape(rows, 1)

    # Lane-aligned I chunk; zero-pad I so the chunk divides it. Padded columns
    # are harmless: sqrelu(0) = 0 and zero Wv rows contribute nothing.
    i_tile_eff = ((max(128, min(i_tile, I)) + 127) // 128) * 128
    I_pad = -(-I // i_tile_eff) * i_tile_eff

    # bf16 weights: native MXU input rate, half the weight VMEM/DMA bytes.
    wk_c = wk_t.astype(compute_dtype)
    wv_c = wv_t.astype(compute_dtype)
    wr_c = wr_t.astype(compute_dtype)
    if I_pad != I:
        wk_c = jnp.pad(wk_c, ((0, 0), (0, I_pad - I)))
        wv_c = jnp.pad(wv_c, ((0, I_pad - I), (0, 0)))

    grid = (num_row_tiles, I_pad // i_tile_eff)

    w_bytes = jnp.dtype(compute_dtype).itemsize
    act_bytes = jnp.dtype(compute_dtype).itemsize
    out_bytes = jnp.dtype(x.dtype).itemsize
    cost = pl.CostEstimate(
        flops=2 * rows * (2 * H * I_pad + H * H),
        transcendentals=rows * H,                   # sigmoid
        bytes_accessed=rows * H * (act_bytes + out_bytes)
                       + (num_row_tiles * 2 * H * I_pad + H * H) * w_bytes,
    )

    out2d = pl.pallas_call(
        _ffn_kernel,
        out_shape=jax.ShapeDtypeStruct((rows, H), x.dtype),
        grid_spec=pltpu.PrefetchScalarGridSpec(
            num_scalar_prefetch=0,
            grid=grid,
            in_specs=[
                pl.BlockSpec((row_tile, H), lambda i, j: (i, 0)),     # x rows
                pl.BlockSpec((None, 1, H), lambda i, j: (i, 0, 0)),   # prev row
                pl.BlockSpec((row_tile, 1), lambda i, j: (i, 0)),     # keep mask
                pl.BlockSpec((1, H), lambda i, j: (0, 0),
                             pipeline_mode=pl.Buffered(1)),           # mu_k
                pl.BlockSpec((1, H), lambda i, j: (0, 0),
                             pipeline_mode=pl.Buffered(1)),           # mu_r
                pl.BlockSpec((H, i_tile_eff), lambda i, j: (0, j)),   # Wk^T chunk
                pl.BlockSpec((i_tile_eff, H), lambda i, j: (j, 0)),   # Wv^T chunk
                pl.BlockSpec((H, H), lambda i, j: (0, 0),
                             pipeline_mode=pl.Buffered(1)),           # Wr^T
            ],
            out_specs=pl.BlockSpec((row_tile, H), lambda i, j: (i, 0)),
            scratch_shapes=[
                pltpu.VMEM((row_tile, H), jnp.float32),    # value accumulator
                pltpu.VMEM((row_tile, H), compute_dtype),  # hoisted key-mix xk
                pltpu.VMEM((row_tile, H), jnp.float32),    # sigmoid(receptance)
            ],
        ),
        compiler_params=pltpu.CompilerParams(
            dimension_semantics=("parallel", "arbitrary"),
            vmem_limit_bytes=vmem_limit_bytes),
        cost_estimate=cost,
    )(x2d, prev_rows, keep, mu_k2d, mu_r2d, wk_c, wv_c, wr_c)

    return out2d.reshape(B, T, H)


def _reference(x, mu_k, mu_r, wk_t, wv_t, wr_t, compute_dtype=jnp.bfloat16):
    """Pure-JAX reference mimicking the kernel's bf16 streaming/MXU numerics."""
    xl = x.astype(compute_dtype).astype(jnp.float32)
    shifted = jnp.concatenate([jnp.zeros_like(xl[:, :1]), xl[:, :-1]], axis=1)
    delta = shifted - xl
    xk = (xl + delta * mu_k).astype(compute_dtype)
    xr = (xl + delta * mu_r).astype(compute_dtype)
    k = jnp.dot(xk, wk_t.astype(compute_dtype),
                preferred_element_type=jnp.float32)
    k = jnp.square(jnp.maximum(k, 0.0))
    v = jnp.dot(k.astype(compute_dtype), wv_t.astype(compute_dtype),
                preferred_element_type=jnp.float32)
    r = jnp.dot(xr, wr_t.astype(compute_dtype),
                preferred_element_type=jnp.float32)
    return (jax.nn.sigmoid(r) * v).astype(x.dtype)


if __name__ == "__main__":
    # Module-implied shapes: hidden_size=32 -> intermediate_size = 32*ceil(32*3.5/32) = 128
    B, T, H = 2, 8, 32
    I = 32 * ((int(H * 3.5) + 31) // 32)  # 128

    key = jax.random.PRNGKey(0)
    kx, kmk, kmr, kwk, kwv, kwr = jax.random.split(key, 6)

    x = jax.random.normal(kx, (B, T, H), dtype=jnp.float32)
    mu_k = jax.random.uniform(kmk, (H,), dtype=jnp.float32)
    mu_r = jax.random.uniform(kmr, (H,), dtype=jnp.float32)
    # nn.Linear weights stored pre-transposed ([in, out] layout)
    wk_t = (jax.random.normal(kwk, (I, H), dtype=jnp.float32) * (H ** -0.5)).T
    wv_t = (jax.random.normal(kwv, (H, I), dtype=jnp.float32) * (I ** -0.5)).T
    wr_t = (jax.random.normal(kwr, (H, H), dtype=jnp.float32) * (H ** -0.5)).T

    out = rwkv6_feedforward(x, mu_k, mu_r, wk_t, wv_t, wr_t)
    out = jax.block_until_ready(out)

    ref = _reference(x, mu_k, mu_r, wk_t, wv_t, wr_t)
    assert out.shape == (B, T, H)
    max_err = float(jnp.max(jnp.abs(out - ref)))
    assert jnp.allclose(out, ref, atol=1e-2, rtol=1e-2), \
        f"mismatch vs reference (max abs err {max_err})"

    print("KERNEL_OK")
</pallas_src>

<mosaic_0001>
module attributes {stable_mosaic.version = 11 : i64} {
  func.func @_ffn_kernel(%arg0: i32, %arg1: i32, %arg2: memref<16x32xbf16, #tpu.memory_space<vmem>>, %arg3: memref<1x1x32xbf16, #tpu.memory_space<vmem>>, %arg4: memref<16x1xf32, #tpu.memory_space<vmem>>, %arg5: memref<1x32xf32, #tpu.memory_space<vmem>>, %arg6: memref<1x32xf32, #tpu.memory_space<vmem>>, %arg7: memref<32x128xbf16, #tpu.memory_space<vmem>>, %arg8: memref<128x32xbf16, #tpu.memory_space<vmem>>, %arg9: memref<32x32xbf16, #tpu.memory_space<vmem>>, %arg10: memref<16x32xf32, #tpu.memory_space<vmem>>, %arg11: memref<16x32xf32, #tpu.memory_space<vmem>>, %arg12: memref<16x32xbf16, #tpu.memory_space<vmem>>, %arg13: memref<16x32xf32, #tpu.memory_space<vmem>>) attributes {dimension_semantics = [#tpu.dimension_semantics<parallel>, #tpu.dimension_semantics<arbitrary>], iteration_bounds = array<i64: 1, 1>, scalar_prefetch = 0 : i64, scratch_operands = 3 : i64, tpu.core_type = #tpu.core_type<tc>, window_params = [{transform_indices = @transform_0, window_bounds = array<i64: 16, 32>}, {transform_indices = @transform_1, window_bounds = array<i64: 1, 1, 32>}, {transform_indices = @transform_2, window_bounds = array<i64: 16, 1>}, {pipeline_mode = #tpu.pipeline_mode<synchronous>, transform_indices = @transform_3, window_bounds = array<i64: 1, 32>}, {pipeline_mode = #tpu.pipeline_mode<synchronous>, transform_indices = @transform_4, window_bounds = array<i64: 1, 32>}, {transform_indices = @transform_5, window_bounds = array<i64: 32, 128>}, {transform_indices = @transform_6, window_bounds = array<i64: 128, 32>}, {pipeline_mode = #tpu.pipeline_mode<synchronous>, transform_indices = @transform_7, window_bounds = array<i64: 32, 32>}, {transform_indices = @transform_8, window_bounds = array<i64: 16, 32>}]} {
    %c0_i32 = arith.constant 0 : i32
    %0 = arith.cmpi eq, %arg1, %c0_i32 : i32
    %1 = arith.extui %0 : i1 to i32
    %c0_i32_0 = arith.constant 0 : i32
    %2 = arith.cmpi ne, %1, %c0_i32_0 : i32
    scf.if %2 {
      %cst_14 = arith.constant 0.000000e+00 : f32
      %18 = vector.broadcast %cst_14 : f32 to vector<16x32xf32>
      %c0_15 = arith.constant 0 : index
      %c0_16 = arith.constant 0 : index
      %19 = vector.load %arg11[%c0_15, %c0_16] : memref<16x32xf32, #tpu.memory_space<vmem>>, vector<16x32xf32>
      tpu.vector_store %arg11[%c0_15, %c0_16], %18 {strides = array<i32>} : memref<16x32xf32, #tpu.memory_space<vmem>>, vector<16x32xf32>,
      %c0_17 = arith.constant 0 : index
      %c0_18 = arith.constant 0 : index
      %20 = vector.load %arg2[%c0_17, %c0_18] : memref<16x32xbf16, #tpu.memory_space<vmem>>, vector<16x32xbf16>
      %21 = arith.extf %20 : vector<16x32xbf16> to vector<16x32xf32>
      %c1_i32 = arith.constant 1 : i32
      %22 = tpu.dynamic_rotate %21 by %c1_i32 dim 0 : vector<16x32xf32>, i32 -> vector<16x32xf32>
      %23 = tpu.iota {dimensions = array<i32: 0>} : vector<16x32xi32>
      %c0_i32_19 = arith.constant 0 : i32
      %24 = vector.broadcast %c0_i32_19 : i32 to vector<16x32xi32>
      %25 = arith.cmpi eq, %23, %24 : vector<16x32xi32>
      %c0_20 = arith.constant 0 : index
      %c0_21 = arith.constant 0 : index
      %c0_22 = arith.constant 0 : index
      %26 = vector.load %arg3[%c0_20, %c0_21, %c0_22] : memref<1x1x32xbf16, #tpu.memory_space<vmem>>, vector<1x1x32xbf16>
      %27 = vector.shape_cast %26 : vector<1x1x32xbf16> to vector<1x32xbf16>
      %28 = arith.extf %27 : vector<1x32xbf16> to vector<1x32xf32>
      %29 = vector.shape_cast %28 : vector<1x32xf32> to vector<1x32xf32>
      %30 = vector.broadcast %29 : vector<1x32xf32> to vector<16x32xf32>
      %31 = arith.select %25, %30, %22 : vector<16x32xi1>, vector<16x32xf32>
      %c0_23 = arith.constant 0 : index
      %c0_24 = arith.constant 0 : index
      %32 = vector.load %arg4[%c0_23, %c0_24] : memref<16x1xf32, #tpu.memory_space<vmem>>, vector<16x1xf32>
      %33 = vector.broadcast %32 : vector<16x1xf32> to vector<16x32xf32>
      %34 = arith.mulf %31, %33 : vector<16x32xf32>
      %35 = arith.subf %34, %21 : vector<16x32xf32>
      %c0_25 = arith.constant 0 : index
      %c0_26 = arith.constant 0 : index
      %36 = vector.load %arg5[%c0_25, %c0_26] : memref<1x32xf32, #tpu.memory_space<vmem>>, vector<1x32xf32>
      %37 = vector.broadcast %36 : vector<1x32xf32> to vector<16x32xf32>
      %38 = arith.mulf %35, %37 : vector<16x32xf32>
      %39 = arith.addf %21, %38 : vector<16x32xf32>
      %40 = arith.truncf %39 : vector<16x32xf32> to vector<16x32xbf16>
      %c0_27 = arith.constant 0 : index
      %c0_28 = arith.constant 0 : index
      %41 = vector.load %arg12[%c0_27, %c0_28] : memref<16x32xbf16, #tpu.memory_space<vmem>>, vector<16x32xbf16>
      tpu.vector_store %arg12[%c0_27, %c0_28], %40 {strides = array<i32>} : memref<16x32xbf16, #tpu.memory_space<vmem>>, vector<16x32xbf16>,
      %c0_29 = arith.constant 0 : index
      %c0_30 = arith.constant 0 : index
      %42 = vector.load %arg6[%c0_29, %c0_30] : memref<1x32xf32, #tpu.memory_space<vmem>>, vector<1x32xf32>
      %43 = vector.broadcast %42 : vector<1x32xf32> to vector<16x32xf32>
      %44 = arith.mulf %35, %43 : vector<16x32xf32>
      %45 = arith.addf %21, %44 : vector<16x32xf32>
      %46 = arith.truncf %45 : vector<16x32xf32> to vector<16x32xbf16>
      %c0_31 = arith.constant 0 : index
      %c0_32 = arith.constant 0 : index
      %47 = vector.load %arg9[%c0_31, %c0_32] : memref<32x32xbf16, #tpu.memory_space<vmem>>, vector<32x32xbf16>
      %cst_33 = arith.constant dense<0.000000e+00> : vector<16x32xf32>
      %48 = tpu.matmul %46, %47, %cst_33 {dimension_numbers = #tpu.dot_dimension_numbers<[1], [0], [0], [1], [0, 0, 1, 1], [], []>} : vector<16x32xbf16>, vector<32x32xbf16>, vector<16x32xf32> -> vector<16x32xf32>
      %49 = arith.negf %48 : vector<16x32xf32>
      %50 = math.exp %49 : vector<16x32xf32>
      %cst_34 = arith.constant 1.000000e+00 : f32
      %51 = vector.broadcast %cst_34 : f32 to vector<16x32xf32>
      %52 = arith.addf %51, %50 : vector<16x32xf32>
      %53 = arith.divf %51, %52 : vector<16x32xf32>
      %c0_35 = arith.constant 0 : index
      %c0_36 = arith.constant 0 : index
      %54 = vector.load %arg13[%c0_35, %c0_36] : memref<16x32xf32, #tpu.memory_space<vmem>>, vector<16x32xf32>
      tpu.vector_store %arg13[%c0_35, %c0_36], %53 {strides = array<i32>} : memref<16x32xf32, #tpu.memory_space<vmem>>, vector<16x32xf32>,
    } else {
    }
    %c0 = arith.constant 0 : index
    %c0_1 = arith.constant 0 : index
    %3 = vector.load %arg12[%c0, %c0_1] : memref<16x32xbf16, #tpu.memory_space<vmem>>, vector<16x32xbf16>
    %c0_2 = arith.constant 0 : index
    %c0_3 = arith.constant 0 : index
    %4 = vector.load %arg7[%c0_2, %c0_3] : memref<32x128xbf16, #tpu.memory_space<vmem>>, vector<32x128xbf16>
    %cst = arith.constant dense<0.000000e+00> : vector<16x128xf32>
    %5 = tpu.matmul %3, %4, %cst {dimension_numbers = #tpu.dot_dimension_numbers<[1], [0], [0], [1], [0, 0, 1, 1], [], []>} : vector<16x32xbf16>, vector<32x128xbf16>, vector<16x128xf32> -> vector<16x128xf32>
    %cst_4 = arith.constant 0.000000e+00 : f32
    %6 = vector.broadcast %cst_4 : f32 to vector<16x128xf32>
    %7 = arith.maximumf %5, %6 : vector<16x128xf32>
    %8 = arith.mulf %7, %7 : vector<16x128xf32>
    %c0_5 = arith.constant 0 : index
    %c0_6 = arith.constant 0 : index
    %9 = vector.load %arg11[%c0_5, %c0_6] : memref<16x32xf32, #tpu.memory_space<vmem>>, vector<16x32xf32>
    %10 = arith.truncf %8 : vector<16x128xf32> to vector<16x128xbf16>
    %c0_7 = arith.constant 0 : index
    %c0_8 = arith.constant 0 : index
    %11 = vector.load %arg8[%c0_7, %c0_8] : memref<128x32xbf16, #tpu.memory_space<vmem>>, vector<128x32xbf16>
    %cst_9 = arith.constant dense<0.000000e+00> : vector<16x32xf32>
    %12 = tpu.matmul %10, %11, %cst_9 {dimension_numbers = #tpu.dot_dimension_numbers<[1], [0], [0], [1], [0, 0, 1, 1], [], []>} : vector<16x128xbf16>, vector<128x32xbf16>, vector<16x32xf32> -> vector<16x32xf32>
    %13 = arith.addf %9, %12 : vector<16x32xf32>
    %c0_10 = arith.constant 0 : index
    %c0_11 = arith.constant 0 : index
    %14 = vector.load %arg11[%c0_10, %c0_11] : memref<16x32xf32, #tpu.memory_space<vmem>>, vector<16x32xf32>
    tpu.vector_store %arg11[%c0_10, %c0_11], %13 {strides = array<i32>} : memref<16x32xf32, #tpu.memory_space<vmem>>, vector<16x32xf32>,
    %c0_i32_12 = arith.constant 0 : i32
    %15 = arith.cmpi eq, %arg1, %c0_i32_12 : i32
    %16 = arith.extui %15 : i1 to i32
    %c0_i32_13 = arith.constant 0 : i32
    %17 = arith.cmpi ne, %16, %c0_i32_13 : i32
    scf.if %17 {
      %c0_14 = arith.constant 0 : index
      %c0_15 = arith.constant 0 : index
      %18 = vector.load %arg13[%c0_14, %c0_15] : memref<16x32xf32, #tpu.memory_space<vmem>>, vector<16x32xf32>
      %c0_16 = arith.constant 0 : index
      %c0_17 = arith.constant 0 : index
      %19 = vector.load %arg11[%c0_16, %c0_17] : memref<16x32xf32, #tpu.memory_space<vmem>>, vector<16x32xf32>
      %20 = arith.mulf %18, %19 : vector<16x32xf32>
      %c0_18 = arith.constant 0 : index
      %c0_19 = arith.constant 0 : index
      %21 = vector.load %arg10[%c0_18, %c0_19] : memref<16x32xf32, #tpu.memory_space<vmem>>, vector<16x32xf32>
      tpu.vector_store %arg10[%c0_18, %c0_19], %20 {strides = array<i32>} : memref<16x32xf32, #tpu.memory_space<vmem>>, vector<16x32xf32>,
    } else {
    }
    return
  }
  func.func @transform_0(%arg0: i32, %arg1: i32) -> (i32, i32) {
    %c0_i32 = arith.constant 0 : i32
    %c0_i32_0 = arith.constant 0 : i32
    return %arg0, %c0_i32 : i32, i32
  }
  func.func @transform_1(%arg0: i32, %arg1: i32) -> (i32, i32, i32) {
    %c0_i32 = arith.constant 0 : i32
    %c0_i32_0 = arith.constant 0 : i32
    %c0_i32_1 = arith.constant 0 : i32
    return %arg0, %c0_i32, %c0_i32_0 : i32, i32, i32
  }
  func.func @transform_2(%arg0: i32, %arg1: i32) -> (i32, i32) {
    %c0_i32 = arith.constant 0 : i32
    %c0_i32_0 = arith.constant 0 : i32
    return %arg0, %c0_i32 : i32, i32
  }
  func.func @transform_3(%arg0: i32, %arg1: i32) -> (i32, i32) {
    %c0_i32 = arith.constant 0 : i32
    %c0_i32_0 = arith.constant 0 : i32
    %c0_i32_1 = arith.constant 0 : i32
    return %c0_i32, %c0_i32_0 : i32, i32
  }
  func.func @transform_4(%arg0: i32, %arg1: i32) -> (i32, i32) {
    %c0_i32 = arith.constant 0 : i32
    %c0_i32_0 = arith.constant 0 : i32
    %c0_i32_1 = arith.constant 0 : i32
    return %c0_i32, %c0_i32_0 : i32, i32
  }
  func.func @transform_5(%arg0: i32, %arg1: i32) -> (i32, i32) {
    %c0_i32 = arith.constant 0 : i32
    %c0_i32_0 = arith.constant 0 : i32
    return %c0_i32, %arg1 : i32, i32
  }
  func.func @transform_6(%arg0: i32, %arg1: i32) -> (i32, i32) {
    %c0_i32 = arith.constant 0 : i32
    %c0_i32_0 = arith.constant 0 : i32
    return %arg1, %c0_i32 : i32, i32
  }
  func.func @transform_7(%arg0: i32, %arg1: i32) -> (i32, i32) {
    %c0_i32 = arith.constant 0 : i32
    %c0_i32_0 = arith.constant 0 : i32
    %c0_i32_1 = arith.constant 0 : i32
    return %c0_i32, %c0_i32_0 : i32, i32
  }
  func.func @transform_8(%arg0: i32, %arg1: i32) -> (i32, i32) {
    %c0_i32 = arith.constant 0 : i32
    %c0_i32_0 = arith.constant 0 : i32
    return %arg0, %c0_i32 : i32, i32
  }
}

</mosaic_0001>

<bundles_post_ra>
// kernel: tpu_custom_call.1
= control target key start
LH: loop header
LB: loop body
LE: loop exit
PB: predicated region body
PF: predicated region fallthrough
CT: control target
= control target key end

     0   :  { %v504_v1 = vmov 0   ;;  %vm35_vm0 = vcmask 261120   ;;  %v505_v4 = vmov 0.0   ;;  %s652_s0 = inlined_call_operand.vmem [shape: bf16[16,32], index: 0, kind: input, shape index: {}]   ;;  %s653_s1 = inlined_call_operand.vmem [shape: bf16[1,1,32], index: 1, kind: input, shape index: {}]   ;;  %s654_s2 = inlined_call_operand.vmem [shape: f32[16,1], index: 2, kind: input, shape index: {}]   ;;  %s655_s3 = inlined_call_operand.vmem [shape: f32[1,32], index: 3, kind: input, shape index: {}]   ;;  %s656_s4 = inlined_call_operand.vmem [shape: f32[1,32], index: 4, kind: input, shape index: {}]   ;;  %s657_s5 = inlined_call_operand.vmem [shape: bf16[32,128], index: 5, kind: input, shape index: {}]   ;;  %s658_s6 = inlined_call_operand.vmem [shape: bf16[128,32], index: 6, kind: input, shape index: {}]   ;;  %s659_s7 = inlined_call_operand.vmem [shape: bf16[32,32], index: 7, kind: input, shape index: {}]   ;;  %s660_s8 = inlined_call_operand.hbm [shape: f32[16,32], index: 8, kind: output, shape index: {}]  }
   0x1   :  { %v60_v0 = vld [vmem:[%s654_s2] sm:$0xff]  ;;  %459 = vset.pattern.permute.xlu0 %v504_v1  ;;  %v61_v2 = vld [vmem:[%s654_s2 + $0x8] sm:$0xff]  ;;  %417 = vmatprep.subr.bf16.mxu1 %v505_v4  ;;  %36 = vst.msk [vmem:[#allocation2] sm:$0xff] %vm35_vm0, %v505_v4  ;;  %37 = vst.msk [vmem:[#allocation2 + $0x8] sm:$0xff] %vm35_vm0, %v505_v4 }
   0x2   :  { %64 = vperm.xlu0 %459, %v60_v0   ;;  %v460_v3 = vld [vmem:[%s659_s7] sm:$0xff]   ;;  %433 = vmatprep.subr.bf16.mxu0 %v505_v4  ;;  %v461_v5 = vld [vmem:[%s659_s7 + $0x8] sm:$0xff]  }
   0x3   :  { %418 = vmatpush3.bf16.msra.mxu1 %v460_v3 }
   0x4   :  { %419 = vmatprep.subr.bf16.mxu1 %v505_v4 }
   0x6   :  { %69 = vperm.xlu0 %459, %v61_v2  }
   0x7   :  { %13 = vsyncpa [#allocation6], 0  ;;  %420 = vmatpush3.bf16.msra.mxu1 %v461_v5  ;;  %vm506_vm1 = vmmov 0   ;;  %v464_v6 = vld [vmem:[%s658_s6] sm:$0xff]   ;;  %v465_v7 = vld [vmem:[%s658_s6 + $0x8] sm:$0xff]   ;;  %v44_v10 = vlaneseq }
   0x8   :  { %425 = vmatprep.subr.bf16.mxu1 %v505_v4  ;;  %421 = vmatprep.mubr.msk.bf16.mxu1 %vm506_vm1, %v505_v4  ;;  %v466_v8 = vld [vmem:[%s658_s6 + $0x10] sm:$0xff]   ;;  %v467_v9 = vld [vmem:[%s658_s6 + $0x18] sm:$0xff]   ;;  %v399_v11 = vld [vmem:[%s652_s0] sm:$0xff]  }
   0x9   :  { %449 = vmatprep.mubr.msk.bf16.mxu0 %vm506_vm1, %v505_v4  ;;  %434 = vmatpush3.bf16.msra.mxu0 %v464_v6  ;;  %v45_v12 = vshrl.u32 %v44_v10, 7  ;;  %v400_v13 = vunpack.c.l.bf16 %v399_v11  ;;  %v401_v14 = vunpack.c.h.bf16 %v399_v11  ;;  %v52_v15 = vld [vmem:[%s653_s1] sm:$0x1]  ;;  %v463_v43 = vld [vmem:[%s657_s5 + $0x8] sm:$0xff]   ;;  %v470_v47 = vld [vmem:[%s658_s6 + $0x30] sm:$0xff]  }
   0xa   :  { %435 = vmatprep.subr.bf16.mxu0 %v505_v4  ;;  %v53_v16 = vunpack.c.l.bf16 %v52_v15  ;;  %v380_v27 = vld [vmem:[%s655_s3] ss:$0 sm:$0xff]  ;;  %v469_v46 = vld [vmem:[%s658_s6 + $0x28] sm:$0xff]   ;;  %v471_v48 = vld [vmem:[%s658_s6 + $0x38] sm:$0xff]  }
   0xb   :  { %v56_v17 = vsub.s32 0, %v45_v12  ;;  %v42_v18 = vrot.slane %v400_v13, 7  ;;  %v43_v19 = vrot.slane %v401_v14, 7  ;;  %vm46_vm2 = vcmp.lt.s32.totalorder %v45_v12, 1  ;;  %v381_v28 = vld [vmem:[%s656_s4] ss:$0 sm:$0xff] }
   0xc   :  { %vm50_vm3 = vcmp.eq.s32.totalorder %v45_v12, 0  ;;  %v462_v40 = vld [vmem:[%s657_s5] sm:$0xff]  }
   0xd   :  { %436 = vmatpush3.bf16.msra.mxu0 %v465_v7  ;;  %v57_v20 = vrot.slane %v53_v16, %v56_v17  ;;  %v48_v21 = vsel %vm46_vm2, %v43_v19, %v42_v18  ;;  %v47_v25 = vsel %vm46_vm2, %v42_v18, %v43_v19  ;;  %v468_v45 = vld [vmem:[%s658_s6 + $0x20] sm:$0xff]   ;;  %s507_s6 = smov [#allocation5]  }
   0xe   :  { %437 = vmatprep.subr.bf16.mxu0 %v505_v4  ;;  %v241_v6 = vld [vmem:[#allocation2] sm:$0xff]  ;;  %s369_s11 = sshll.u32 %s507_s6, 4  ;;  %s370_s11 = int_to_ptr.vmem [resolvable:$true] %s369_s11 }
   0xf   :  { %v58_v22 = vsel %vm50_vm3, %v57_v20, %v48_v21  ;;  %s480_s12 = scalar_lea.vmem %s370_s11, 256  ;;  %p485_p1 = scmp.lt.s32.totalorder %s370_s11, %s370_s11 }
  0x10   :  { %p481_p0 = scmp.ne.s32.totalorder %s370_s11, %s480_s12  ;;  %p486_p2 = scmp.lt.s32.totalorder %s480_s12, %s480_s12 }
  0x11   :  { %438 = vmatpush3.bf16.msra.mxu0 %v466_v8  ;;  %v242_v8 = vld [vmem:[#allocation2 + $0x8] sm:$0xff] }
  0x12   :  { %439 = vmatprep.subr.bf16.mxu0 %v505_v4  ;;  %p487_p3 = por %p486_p2, %p485_p1 }
  0x14   :  { %p488_p4 = pnand %p487_p3, %p481_p0 }
  0x15   :  { %440 = vmatpush3.bf16.msra.mxu0 %v467_v9 }
  0x16   :  { %441 = vmatprep.subr.bf16.mxu0 %v505_v4 }
  0x19   :  { %442 = vmatpush3.bf16.msra.mxu0 %v468_v45 }
  0x1a   :  { %443 = vmatprep.subr.bf16.mxu0 %v505_v4 }
  0x1d   :  { %444 = vmatpush3.bf16.msra.mxu0 %v469_v46 }
  0x1e   :  { %445 = vmatprep.subr.bf16.mxu0 %v505_v4 }
  0x21   :  { %446 = vmatpush3.bf16.msra.mxu0 %v470_v47 }
  0x22   :  { %447 = vmatprep.subr.bf16.mxu0 %v505_v4 }
  0x25   :  { %448 = vmatpush3.bf16.msra.mxu0 %v471_v48 }
  0x81   :  { %v65_v23 = vpop.permute.xlu0 %64 }
  0x82   :  { %v72_v24 = vmul.f32 %v65_v23, %v58_v22 }
  0x84   :  { %v74_v26 = vsub.f32 %v72_v24, %v400_v13 }
  0x85   :  { %v70_v29 = vpop.permute.xlu0 %69 }
  0x86   :  { %v73_v30 = vmul.f32 %v70_v29, %v47_v25  ;;  %v83_v31 = vmul.f32 %v380_v27, %v74_v26  ;;  %v96_v32 = vmul.f32 %v381_v28, %v74_v26 }
  0x88   :  { %v75_v33 = vsub.f32 %v73_v30, %v401_v14  ;;  %v85_v36 = vadd.f32 %v400_v13, %v83_v31  ;;  %v98_v37 = vadd.f32 %v400_v13, %v96_v32 }
  0x8a   :  { %v84_v34 = vmul.f32 %v380_v27, %v75_v33  ;;  %v97_v35 = vmul.f32 %v381_v28, %v75_v33 }
  0x8c   :  { %v86_v38 = vadd.f32 %v401_v14, %v84_v34  ;;  %v99_v39 = vadd.f32 %v401_v14, %v97_v35 }
  0x8e   :  { %v87_v41 = vpack.c.bf16 %v86_v38, %v85_v36  ;;  %v100_v42 = vpack.c.bf16 %v99_v39, %v98_v37 }
  0x90   :  { %88 = vst.msk [vmem:[#allocation3] sm:$0xff] %vm35_vm0, %v87_v41  ;;  %422 = vmatmul.mubr.msk.bf16.vlgmr.msra.gmra.mrb[0].mxu1 %vm35_vm0, %v100_v42 }
  0x91   :  { %426 = vmatpush3.bf16.msra.mxu1 %v462_v40  ;;  %429 = vmatprep.mubr.msk.bf16.mxu1 %vm506_vm1, %v505_v4 }
  0x92   :  { %427 = vmatprep.subr.bf16.mxu1 %v505_v4 }
  0x95   :  { %428 = vmatpush3.bf16.msra.mxu1 %v463_v43 }
  0x97   :  { %v175_v44 = vld [vmem:[#allocation3] sm:$0xff] }
  0x98   :  { %430 = vmatmul.mubr.msk.bf16.vlgmr.msra.gmra.mrb[4].mxu1 %vm35_vm0, %v175_v44 }
 0x163   :  { %v154_v49 = vpop.f32.mrb[0].mxu1 }
 0x164   :  { %v385_v50 = vmul.f32 -1.442695, %v154_v49  ;;  %v423_v51 = vpop.f32.mrb[1].mxu1 }
 0x165   :  { %v157_v52 = vpop.f32.mrb[2].mxu1 }
 0x166   :  { %472 = vpow2.f32 %v385_v50  ;;  %v386_v53 = vmul.f32 -1.442695, %v157_v52  ;;  %v424_v54 = vpop.f32.mrb[3].mxu1 }
 0x168   :  { %474 = vpow2.f32 %v386_v53 }
 0x16b   :  { %v230_v55 = vpop.f32.mrb[4].mxu1 }
 0x16c   :  { %v237_v56 = vmax.f32 %v230_v55, 0.0  ;;  %v431_v57 = vpop.f32.mrb[5].mxu1 }
 0x16d   :  { %v233_v58 = vpop.f32.mrb[6].mxu1 }
 0x16e   :  { %v238_v59 = vmax.f32 %v233_v58, 0.0  ;;  %v432_v60 = vpop.f32.mrb[7].mxu1  ;;  %v239_v62 = vmul.f32 %v237_v56, %v237_v56 }
 0x170   :  { %v473_v61 = vpop.eup %472  ;;  %v240_v63 = vmul.f32 %v238_v59, %v238_v59 }
 0x171   :  { %v167_v0 = vadd.f32 1.0, %v473_v61 }
 0x172   :  { %v475_v1 = vpop.eup %474  ;;  %v243_v2 = vpack.c.bf16 %v240_v63, %v239_v62 }
 0x173   :  { %476 = vrcp.f32 %v167_v0  ;;  %v168_v3 = vadd.f32 1.0, %v475_v1 }
 0x174   :  { %450 = vmatmul.mubr.bf16.vlgmr.msra.gmra.mrb[0].mxu0 %v243_v2 }
 0x175   :  { %478 = vrcp.f32 %v168_v3 }
 0x17d   :  { %v477_v4 = vpop.eup %476 }
 0x17e   :  { %173 = vst.msk [vmem:[#allocation4] sm:$0xff] %vm35_vm0, %v477_v4 }
 0x17f   :  { %v479_v5 = vpop.eup %478 }
 0x180   :  { %174 = vst.msk [vmem:[#allocation4 + $0x8] sm:$0xff] %vm35_vm0, %v479_v5 }
 0x185   :  { %v356_v14 = vld [vmem:[#allocation4] sm:$0xff] }
 0x187   :  { %v357_v17 = vld [vmem:[#allocation4 + $0x8] sm:$0xff] }
 0x247   :  { %v342_v7 = vpop.f32.mrb[0].mxu0 }
 0x248   :  { %v349_v9 = vadd.f32 %v342_v7, %v241_v6  ;;  %v451_v10 = vpop.f32.mrb[1].mxu0 }
 0x249   :  { %v345_v11 = vpop.f32.mrb[2].mxu0 }
 0x24a   :  { %351 = vst.msk [vmem:[#allocation2] sm:$0xff] %vm35_vm0, %v349_v9  ;;  %v350_v12 = vadd.f32 %v345_v11, %v242_v8  ;;  %v452_v13 = vpop.f32.mrb[3].mxu0 }
 0x24c   :  { %352 = vst.msk [vmem:[#allocation2 + $0x8] sm:$0xff] %vm35_vm0, %v350_v12 }
 0x251   :  { %v358_v15 = vld [vmem:[#allocation2] sm:$0xff] }
 0x252   :  { %v360_v16 = vmul.f32 %v358_v15, %v356_v14 }
 0x253   :  { %v359_v18 = vld [vmem:[#allocation2 + $0x8] sm:$0xff] }
 0x254   :  { %v361_v19 = vmul.f32 %v359_v18, %v357_v17  ;;  %362 = vst.msk [vmem:[#allocation5] sm:$0xff] %vm35_vm0, %v360_v16 }
 0x256   :  { %363 = vst.msk [vmem:[#allocation5 + $0x8] sm:$0xff] %vm35_vm0, %v361_v19 }
 0x257   :  { %491 = shalt.err (!%p488_p4)
}
 0x258   :  { %s492_s15 = scalar_lea.hbm %s660_s8, 256 }
 0x259   :  { %p493_p5 = scmp.ne.s32.totalorder %s660_s8, %s492_s15  ;;  %p496_p6 = scmp.lt.u32.totalorder %s492_s15, %s660_s8 }
 0x25b   :  { %p498_p7 = pnand %p496_p6, %p493_p5 }
 0x25d   :  { %501 = shalt.err (!%p498_p7)
}
 0x25e   :  { %s508_s19 = smov 128   ;;  %s509_s20 = smov 8  }
 0x25f   :  { %375 = dma.vmem_to_hbm [thread:$0]  %s370_s11, 256, %s660_s8, [#allocation6], %s508_s19, %s508_s19, %s509_s20  }
 0x260   :  { %502 = dma.done.wait [#allocation6], 256  }
 0x261   :  { %503 = vsyncadd [#allocation6], 4294967040 }
 0x262   :  { %379 = vsyncpa [#allocation6], 1 }

</bundles_post_ra>
